<compile_context>
chip_gen: v6e
topology: v6e:2x2x1
jax: 0.10.0
libtpu: 0.0.40
codegen_flags: <defaults>
</compile_context>

<pallas_src>
import functools

import jax
import jax.numpy as jnp
from jax.experimental import pallas as pl
from jax.experimental.pallas import tpu as pltpu

_LANES = 128
_BLOCK_BYTES = 4 * 1024 * 1024   # per input block per grid step (dtype-aware rows)
_ACC_ROWS = 256                  # fixed f32 accumulator rows (128 KiB)
_NUM_SHARDS = 2                  # leading parallel axis (v7x megacore; serial elsewhere)


def _round_up(x: int, m: int) -> int:
    return ((x + m - 1) // m) * m


def _simse_kernel(pred_ref, real_ref, out_ref, acc_ref, *,
                  block_rows, acc_rows, blocks_per_shard, total_blocks,
                  rows, need_mask):
    c = pl.program_id(0)   # shard index
    i = pl.program_id(1)   # block index within this shard

    @pl.when(i == 0)
    def _():
        acc_ref[...] = jnp.zeros_like(acc_ref)

    # Elementwise diff in f32 (cast per-tile on the VPU; inputs stay native dtype).
    diff = real_ref[...].astype(jnp.float32) - pred_ref[...].astype(jnp.float32)

    def _accumulate(d):
        # Fold (block_rows, 128) -> (acc_rows, 128) with sublane-grouped VPU adds,
        # then accumulate into the small resident accumulator.
        k = block_rows // acc_rows
        if k > 1:
            d = jnp.sum(d.reshape(k, acc_rows, _LANES), axis=0)
        acc_ref[...] += d

    if need_mask:
        # NOTE: int32 index math; overflows only for > ~2.7e11 elements (> HBM).
        g = c * blocks_per_shard + i          # intended global block index
        last = total_blocks - 1

        @pl.when(g < last)
        def _():                              # hot interior blocks: mask-free
            _accumulate(diff)

        @pl.when(g >= last)
        def _():                              # partial last block / clamped dups
            row_ids = jax.lax.broadcasted_iota(jnp.int32, diff.shape, 0)
            _accumulate(jnp.where(g * block_rows + row_ids < rows, diff, 0.0))
    else:
        _accumulate(diff)

    @pl.when(i == pl.num_programs(1) - 1)
    def _():
        # One-time cross-lane/sublane reduce -> per-shard partial sum.
        out_ref[0, 0] = jnp.sum(acc_ref[...])


def simse(pred: jax.Array, real: jax.Array) -> jax.Array:
    """Pallas TPU implementation of SIMSE.forward(pred, real)."""
    assert pred.shape == real.shape, "pred/real must have identical shapes"
    assert pred.dtype == real.dtype, "pred/real must have identical dtypes"

    n = pred.size  # torch.numel
    itemsize = jnp.dtype(pred.dtype).itemsize
    sub_mult = max(8, 32 // max(1, itemsize))  # 8 (f32), 16 (bf16), 32 (int8/fp8)

    pred_flat = pred.reshape(-1)
    real_flat = real.reshape(-1)

    # Lane-aligned prefix goes through the kernel; the <128-element tail is a
    # tiny XLA sum (no full padded copies of the inputs in HBM).
    n_main = (n // _LANES) * _LANES
    rows = n_main // _LANES

    tail_sum = None
    if n_main < n:
        tail_sum = jnp.sum(real_flat[n_main:].astype(jnp.float32)
                           - pred_flat[n_main:].astype(jnp.float32))

    if rows == 0:
        s = tail_sum  # everything fit in the tail
    else:
        if n_main == n:
            pred2d = pred_flat.reshape(rows, _LANES)
            real2d = real_flat.reshape(rows, _LANES)
        else:
            pred2d = pred_flat[:n_main].reshape(rows, _LANES)
            real2d = real_flat[:n_main].reshape(rows, _LANES)

        # Dtype-aware block sizing: keep bytes/step constant across precisions.
        target_rows = max(sub_mult, _BLOCK_BYTES // (_LANES * itemsize))
        block_rows = min(target_rows, _round_up(rows, sub_mult))
        acc_rows = min(_ACC_ROWS, block_rows)
        block_rows = _round_up(block_rows, acc_rows)

        total_blocks = pl.cdiv(rows, block_rows)
        shards = min(_NUM_SHARDS, total_blocks)
        blocks_per_shard = pl.cdiv(total_blocks, shards)
        need_mask = (shards * blocks_per_shard * block_rows != rows)

        kernel = functools.partial(
            _simse_kernel,
            block_rows=block_rows,
            acc_rows=acc_rows,
            blocks_per_shard=blocks_per_shard,
            total_blocks=total_blocks,
            rows=rows,
            need_mask=need_mask,
        )

        def in_map(c, i):
            # Clamp so the DMA start is always in-bounds; the in-kernel mask
            # zeroes any duplicated / out-of-range contribution.
            return (jnp.minimum(c * blocks_per_shard + i, total_blocks - 1), 0)

        # Explicit VMEM budget: 2 inputs x 2 buffers x block + accumulator + slack.
        block_bytes = block_rows * _LANES * itemsize
        acc_bytes = acc_rows * _LANES * 4
        vmem_limit = min(30 << 20,
                         max(16 << 20, 4 * block_bytes + acc_bytes + (4 << 20)))

        cost = pl.CostEstimate(
            flops=2 * n_main,
            transcendentals=0,
            bytes_accessed=2 * n_main * itemsize + shards * 4,
        )

        partials = pl.pallas_call(
            kernel,
            out_shape=jax.ShapeDtypeStruct((shards, 1), jnp.float32),
            grid_spec=pltpu.PrefetchScalarGridSpec(
                num_scalar_prefetch=0,
                grid=(shards, blocks_per_shard),
                in_specs=[
                    pl.BlockSpec((block_rows, _LANES), in_map),
                    pl.BlockSpec((block_rows, _LANES), in_map),
                ],
                out_specs=pl.BlockSpec(
                    (1, 1), lambda c, i: (c, 0), memory_space=pltpu.SMEM
                ),
                scratch_shapes=[pltpu.VMEM((acc_rows, _LANES), jnp.float32)],
            ),
            compiler_params=pltpu.CompilerParams(
                dimension_semantics=("parallel", "arbitrary"),
                vmem_limit_bytes=int(vmem_limit),
            ),
            cost_estimate=cost,
        )(pred2d, real2d)

        s = jnp.sum(partials)
        if tail_sum is not None:
            s = s + tail_sum

    # simse = (sum diff)^2 / n^2 == (sum diff / n)^2  (better f32 behavior).
    inv_n = jnp.float32(1.0 / n)
    scaled = s * inv_n
    return scaled * scaled


def simse_ref(pred, real):
    diffs = real - pred
    n = diffs.size
    return jnp.sum(diffs) ** 2 / (n ** 2)


if __name__ == "__main__":
    key = jax.random.PRNGKey(0)
    k1, k2 = jax.random.split(key)
    shape = (2, 4, 16, 16)  # small NCHW-like shape consistent with usage
    pred = jax.random.normal(k1, shape, dtype=jnp.float32)
    real = jax.random.normal(k2, shape, dtype=jnp.float32)

    out = jax.block_until_ready(simse(pred, real))
    ref = jax.block_until_ready(simse_ref(pred, real))

    assert out.shape == ()
    assert jnp.allclose(out, ref, rtol=1e-5, atol=1e-6), (out, ref)
    print("KERNEL_OK")
</pallas_src>

<mosaic_0001>
module attributes {stable_mosaic.version = 11 : i64} {
  func.func @_simse_kernel(%arg0: i32, %arg1: i32, %arg2: memref<16x128xf32, #tpu.memory_space<vmem>>, %arg3: memref<16x128xf32, #tpu.memory_space<vmem>>, %arg4: memref<1x1xf32, #tpu.memory_space<smem>>, %arg5: memref<16x128xf32, #tpu.memory_space<vmem>>) attributes {dimension_semantics = [#tpu.dimension_semantics<parallel>, #tpu.dimension_semantics<arbitrary>], iteration_bounds = array<i64: 1, 1>, scalar_prefetch = 0 : i64, scratch_operands = 1 : i64, tpu.core_type = #tpu.core_type<tc>, window_params = [{transform_indices = @transform_0, window_bounds = array<i64: 16, 128>}, {transform_indices = @transform_1, window_bounds = array<i64: 16, 128>}, {transform_indices = @transform_2, window_bounds = array<i64: 1, 1>}]} {
    %c0_i32 = arith.constant 0 : i32
    %0 = arith.cmpi eq, %arg1, %c0_i32 : i32
    %1 = arith.extui %0 : i1 to i32
    %c0_i32_0 = arith.constant 0 : i32
    %2 = arith.cmpi ne, %1, %c0_i32_0 : i32
    scf.if %2 {
      %cst = arith.constant 0.000000e+00 : f32
      %12 = vector.broadcast %cst : f32 to vector<16x128xf32>
      %c0_10 = arith.constant 0 : index
      %c0_11 = arith.constant 0 : index
      %13 = vector.load %arg5[%c0_10, %c0_11] : memref<16x128xf32, #tpu.memory_space<vmem>>, vector<16x128xf32>
      tpu.vector_store %arg5[%c0_10, %c0_11], %12 {strides = array<i32>} : memref<16x128xf32, #tpu.memory_space<vmem>>, vector<16x128xf32>,
    } else {
    }
    %c0 = arith.constant 0 : index
    %c0_1 = arith.constant 0 : index
    %3 = vector.load %arg3[%c0, %c0_1] : memref<16x128xf32, #tpu.memory_space<vmem>>, vector<16x128xf32>
    %c0_2 = arith.constant 0 : index
    %c0_3 = arith.constant 0 : index
    %4 = vector.load %arg2[%c0_2, %c0_3] : memref<16x128xf32, #tpu.memory_space<vmem>>, vector<16x128xf32>
    %5 = arith.subf %3, %4 : vector<16x128xf32>
    %c0_4 = arith.constant 0 : index
    %c0_5 = arith.constant 0 : index
    %6 = vector.load %arg5[%c0_4, %c0_5] : memref<16x128xf32, #tpu.memory_space<vmem>>, vector<16x128xf32>
    %7 = arith.addf %6, %5 : vector<16x128xf32>
    %c0_6 = arith.constant 0 : index
    %c0_7 = arith.constant 0 : index
    %8 = vector.load %arg5[%c0_6, %c0_7] : memref<16x128xf32, #tpu.memory_space<vmem>>, vector<16x128xf32>
    tpu.vector_store %arg5[%c0_6, %c0_7], %7 {strides = array<i32>} : memref<16x128xf32, #tpu.memory_space<vmem>>, vector<16x128xf32>,
    %c0_i32_8 = arith.constant 0 : i32
    %9 = arith.cmpi eq, %arg1, %c0_i32_8 : i32
    %10 = arith.extui %9 : i1 to i32
    %c0_i32_9 = arith.constant 0 : i32
    %11 = arith.cmpi ne, %10, %c0_i32_9 : i32
    scf.if %11 {
      %c0_10 = arith.constant 0 : index
      %c0_11 = arith.constant 0 : index
      %12 = vector.load %arg5[%c0_10, %c0_11] : memref<16x128xf32, #tpu.memory_space<vmem>>, vector<16x128xf32>
      %13 = vector.shape_cast %12 : vector<16x128xf32> to vector<1x16x128xf32>
      %cst = arith.constant dense<0.000000e+00> : vector<1xf32>
      %14 = vector.multi_reduction <add>, %13, %cst [1, 2] : vector<1x16x128xf32> to vector<1xf32>
      %15 = vector.shape_cast %14 : vector<1xf32> to vector<1x1x1xf32>
      %16 = vector.extract %15[0, 0, 0] : f32 from vector<1x1x1xf32>
      %c0_12 = arith.constant 0 : index
      %c0_13 = arith.constant 0 : index
      %17 = memref.load %arg4[%c0_12, %c0_13] : memref<1x1xf32, #tpu.memory_space<smem>>
      memref.store %16, %arg4[%c0_12, %c0_13] : memref<1x1xf32, #tpu.memory_space<smem>>
    } else {
    }
    return
  }
  func.func @transform_0(%arg0: i32, %arg1: i32) -> (i32, i32) {
    %c1_i32 = arith.constant 1 : i32
    %0 = arith.muli %arg0, %c1_i32 : i32
    %1 = arith.addi %0, %arg1 : i32
    %c0_i32 = arith.constant 0 : i32
    %2 = arith.minsi %1, %c0_i32 : i32
    %c0_i32_0 = arith.constant 0 : i32
    %c0_i32_1 = arith.constant 0 : i32
    return %2, %c0_i32_0 : i32, i32
  }
  func.func @transform_1(%arg0: i32, %arg1: i32) -> (i32, i32) {
    %c1_i32 = arith.constant 1 : i32
    %0 = arith.muli %arg0, %c1_i32 : i32
    %1 = arith.addi %0, %arg1 : i32
    %c0_i32 = arith.constant 0 : i32
    %2 = arith.minsi %1, %c0_i32 : i32
    %c0_i32_0 = arith.constant 0 : i32
    %c0_i32_1 = arith.constant 0 : i32
    return %2, %c0_i32_0 : i32, i32
  }
  func.func @transform_2(%arg0: i32, %arg1: i32) -> (i32, i32) {
    %c0_i32 = arith.constant 0 : i32
    %c0_i32_0 = arith.constant 0 : i32
    return %arg0, %c0_i32 : i32, i32
  }
}

</mosaic_0001>

<bundles_post_ra>
// kernel: tpu_custom_call.1
= control target key start
LH: loop header
LB: loop body
LE: loop exit
PB: predicated region body
PF: predicated region fallthrough
CT: control target
= control target key end

     0   :  { %7 = vsyncpa [#allocation4], 0  ;;  %s204_s0 = inlined_call_operand.hbm [shape: f32[16,128], index: 0, kind: input, shape index: {}]   ;;  %s205_s1 = inlined_call_operand.hbm [shape: f32[16,128], index: 1, kind: input, shape index: {}]   ;;  %s206_s2 = inlined_call_operand.hbm [shape: f32[1,1], index: 2, kind: output, shape index: {}]  }
   0x1   :  { %8 = vsyncpa [#allocation7], 0 }
   0x2   :  { %9 = vsyncpa [#allocation5], 0  ;;  %s175_s9 = smov [#allocation3]  }
   0x3   :  { %s21_s10 = sshll.u32 %s175_s9, 4  ;;  %s22_s10 = int_to_ptr.vmem [resolvable:$true] %s21_s10 }
   0x4   :  { %s129_s11 = scalar_lea.vmem %s22_s10, 256  ;;  %p134_p1 = scmp.lt.s32.totalorder %s22_s10, %s22_s10 }
   0x5   :  { %p130_p0 = scmp.ne.s32.totalorder %s22_s10, %s129_s11  ;;  %p135_p2 = scmp.lt.s32.totalorder %s129_s11, %s129_s11 }
   0x7   :  { %p136_p3 = por %p135_p2, %p134_p1 }
   0x9   :  { %p137_p4 = pnand %p136_p3, %p130_p0 }
   0xb   :  { %140 = shalt.err (!%p137_p4)
}
   0xc   :  { %s176_s12 = smov 128   ;;  %s177_s13 = smov 8  }
   0xd   :  { %27 = dma.hbm_to_vmem [thread:$0]  %s204_s0, 256, %s22_s10, [#allocation4], %s176_s12, %s176_s12, %s177_s13  }
   0xe   :  { %s178_s16 = smov [#allocation6]  }
   0xf   :  { %s39_s17 = sshll.u32 %s178_s16, 4  ;;  %s40_s17 = int_to_ptr.vmem [resolvable:$true] %s39_s17 }
  0x10   :  { %s149_s18 = scalar_lea.vmem %s40_s17, 256  ;;  %p154_p6 = scmp.lt.s32.totalorder %s40_s17, %s40_s17 }
  0x11   :  { %p150_p5 = scmp.ne.s32.totalorder %s40_s17, %s149_s18  ;;  %p155_p7 = scmp.lt.s32.totalorder %s149_s18, %s149_s18 }
  0x13   :  { %p156_p8 = por %p155_p7, %p154_p6 }
  0x15   :  { %p157_p9 = pnand %p156_p8, %p150_p5 }
  0x17   :  { %160 = shalt.err (!%p157_p9)
}
  0x18   :  { %45 = dma.hbm_to_vmem [thread:$0]  %s205_s1, 256, %s40_s17, [#allocation7], %s176_s12, %s176_s12, %s177_s13  }
  0x19   :  { %169 = dma.done.wait [#allocation4], 256  }
  0x1a   :  { %170 = vsyncadd [#allocation4], 4294967040 }
  0x1b   :  { %171 = dma.done.wait [#allocation7], 256  }
  0x1c   :  { %172 = vsyncadd [#allocation7], 4294967040  ;;  %v66_v0 = vld [vmem:[#allocation6] sm:$0xff]  ;;  %v67_v1 = vld [vmem:[#allocation6 + $0x8] sm:$0xff]  ;;  %s179_s1 = smov [#allocation8]  }
  0x1d   :  { %v68_v2 = vld [vmem:[#allocation3] sm:$0xff]  ;;  %v69_v3 = vld [vmem:[#allocation3 + $0x8] sm:$0xff] }
  0x1e   :  { %v70_v4 = vsub.f32 %v66_v0, %v68_v2  ;;  %v71_v5 = vsub.f32 %v67_v1, %v69_v3 }
  0x20   :  { %v83_v6 = vadd.f32 %v71_v5, %v70_v4 }
  0x22   :  { %84 = vadd.xlane.f32.xlu0 %v83_v6 }
  0xab   :  { %v85_v7 = vpop.xlane.xlu0 %84 }
  0xac   :  { %v86_v8 = vrot.slane %v85_v7, 4 }
  0xae   :  { %v87_v9 = vadd.f32 %v86_v8, %v85_v7 }
  0xb0   :  { %v88_v10 = vrot.slane %v87_v9, 2 }
  0xb2   :  { %v89_v11 = vadd.f32 %v88_v10, %v87_v9 }
  0xb4   :  { %v90_v12 = vrot.slane %v89_v11, 1 }
  0xb6   :  { %v91_v13 = vadd.f32 %v90_v12, %v89_v11 }
  0xb8   :  { %114 = vpush %v91_v13 }
  0xe9   :  { %s115_s0 = spop %114 }
  0xea   :  { %94 = sst [smem:[#allocation8]] %s115_s0 }
  0xeb   :  { %102 = dma.smem_to_hbm %s179_s1, 16, %s206_s2, [#allocation5]  }
  0xec   :  { %173 = dma.done.wait [#allocation5], 16  }
  0xed   :  { %174 = vsyncadd [#allocation5], 4294967280 }
  0xee   :  { %106 = sfence }
  0xef   :  { %107 = vsyncpa [#allocation4], 1 }
  0xf0   :  { %108 = vsyncpa [#allocation7], 1 }
  0xf1   :  { %109 = vsyncpa [#allocation5], 1 }

</bundles_post_ra>
